<compile_context>
chip_gen: v5e
topology: v5e:2x2
jax: 0.10.0
libtpu: 0.0.40
codegen_flags: <defaults>
</compile_context>

<pallas_src>
import jax
import jax.numpy as jnp
from jax import lax
from jax.experimental import pallas as pl
from jax.experimental.pallas import tpu as pltpu


_NEG_BIG = -1e30  # bias fill for padded vocab columns -> exp(pad - max) == 0


def _round_up(x, m):
    return ((x + m - 1) // m) * m


def _logits(x_ref, w_ref, b_ref):
    # (tm, E) x (tv, E) contracted on E -> (tm, tv) f32 on the MXU.
    return lax.dot_general(
        x_ref[...], w_ref[...],
        dimension_numbers=(((1,), (1,)), ((), ())),
        preferred_element_type=jnp.float32,
    ) + b_ref[...]


# ----------------------------------------------------------------------------
# Fast path: whole (padded) vocab in one tile.
# ----------------------------------------------------------------------------
def _single_pass_kernel(x_ref, w_ref, b_ref, o_ref):
    logits = _logits(x_ref, w_ref, b_ref)                     # (tm, Vp) f32
    m = jnp.max(logits, axis=-1, keepdims=True)
    lse = m + jnp.log(jnp.sum(jnp.exp(logits - m), axis=-1, keepdims=True))
    o_ref[...] = (logits - lse).astype(o_ref.dtype)


# ----------------------------------------------------------------------------
# Streaming path: vocab tiled, two passes (online statistics, then write).
# ----------------------------------------------------------------------------
def _streaming_kernel(x_ref, w_ref, b_ref, o_ref, m_ref, l_ref):
    # x_ref: (tm, E)   compute dtype (resident across p, j)
    # w_ref: (tv, E)   compute dtype (PyTorch (vocab, embed) layout)
    # b_ref: (1, tv)   f32
    # o_ref: (tm, tv)  out dtype
    # m_ref: (tm, 1)   f32 running max
    # l_ref: (tm, 1)   f32 running (rescaled) sum-exp; becomes lse after pass 0
    p = pl.program_id(1)   # 0 = statistics pass, 1 = write pass
    j = pl.program_id(2)   # vocab tile index

    logits = _logits(x_ref, w_ref, b_ref)                      # (tm, tv) f32

    @pl.when(jnp.logical_and(p == 0, j == 0))
    def _():
        m_ref[...] = jnp.full_like(m_ref, -jnp.inf)
        l_ref[...] = jnp.zeros_like(l_ref)

    @pl.when(p == 0)
    def _():
        m_prev = m_ref[...]
        m_new = jnp.maximum(m_prev, jnp.max(logits, axis=-1, keepdims=True))
        l_ref[...] = (l_ref[...] * jnp.exp(m_prev - m_new)
                      + jnp.sum(jnp.exp(logits - m_new), axis=-1, keepdims=True))
        m_ref[...] = m_new

    @pl.when(jnp.logical_and(p == 0, j == pl.num_programs(2) - 1))
    def _():
        # Fold (max, sum-exp) into a single lse once; every write tile reuses it.
        l_ref[...] = m_ref[...] + jnp.log(l_ref[...])

    @pl.when(p == 1)
    def _():
        o_ref[...] = (logits - l_ref[...]).astype(o_ref.dtype)


# ----------------------------------------------------------------------------
# Wrapper
# ----------------------------------------------------------------------------
def vocab_output_log_softmax(x, weight, bias, *,
                             tm=512, tv_max=2048,
                             compute_dtype=jnp.bfloat16,
                             out_dtype=jnp.float32):
    """
    x:      (batch, seq, embed_dim)
    weight: (vocab, embed_dim)   -- PyTorch nn.Linear convention, NOT transposed
    bias:   (vocab,)
    returns (batch, seq, vocab) log-probabilities (out_dtype)
    """
    B, S, E = x.shape
    V = weight.shape[0]
    assert weight.shape == (V, E) and bias.shape == (V,)

    rows = B * S
    tm = max(8, min(tm, _round_up(rows, 8)))     # don't over-pad tiny problems
    rows_p = _round_up(rows, tm)

    vp128 = _round_up(V, 128)
    single_pass = vp128 <= tv_max
    tv = vp128 if single_pass else tv_max
    Vp = vp128 if single_pass else _round_up(V, tv)

    x2 = x.reshape(rows, E)
    if rows_p != rows:
        x2 = jnp.pad(x2, ((0, rows_p - rows), (0, 0)))
    w = weight
    b = bias
    if Vp != V:
        w = jnp.pad(w, ((0, Vp - V), (0, 0)))
        b = jnp.pad(b, ((0, Vp - V),), constant_values=_NEG_BIG)

    # bf16 feed for the MXU; softmax math stays f32.
    # TODO(synk): store the weight in compute_dtype in HBM at parameter-creation
    # time to avoid the per-call cast.
    x2 = x2.astype(compute_dtype)
    w = w.astype(compute_dtype)
    b2 = b.astype(jnp.float32).reshape(1, Vp)

    if single_pass:
        out = pl.pallas_call(
            _single_pass_kernel,
            out_shape=jax.ShapeDtypeStruct((rows_p, Vp), out_dtype),
            grid_spec=pltpu.PrefetchScalarGridSpec(
                num_scalar_prefetch=0,
                grid=(rows_p // tm,),
                in_specs=[
                    pl.BlockSpec((tm, E), lambda i: (i, 0)),   # x row tile
                    pl.BlockSpec((Vp, E), lambda i: (0, 0)),   # full weight, resident
                    pl.BlockSpec((1, Vp), lambda i: (0, 0)),   # full bias, resident
                ],
                out_specs=pl.BlockSpec((tm, Vp), lambda i: (i, 0)),
            ),
            compiler_params=pltpu.CompilerParams(
                dimension_semantics=("parallel",),
                vmem_limit_bytes=64 * 1024 * 1024,
            ),
        )(x2, w, b2)
    else:
        grid = (rows_p // tm, 2, Vp // tv)
        out = pl.pallas_call(
            _streaming_kernel,
            out_shape=jax.ShapeDtypeStruct((rows_p, Vp), out_dtype),
            grid_spec=pltpu.PrefetchScalarGridSpec(
                num_scalar_prefetch=0,
                grid=grid,
                in_specs=[
                    pl.BlockSpec((tm, E), lambda i, p, j: (i, 0)),   # x tile (resident over p, j)
                    pl.BlockSpec((tv, E), lambda i, p, j: (j, 0)),   # weight (V,E) tile
                    pl.BlockSpec((1, tv), lambda i, p, j: (0, j)),   # bias tile
                ],
                # Statistics pass (p == 0) pins the output block at (i, 0): no
                # garbage blocks are flushed, every block is written exactly
                # once during the write pass (p == 1).
                out_specs=pl.BlockSpec((tm, tv), lambda i, p, j: (i, j * p)),
                scratch_shapes=[
                    pltpu.VMEM((tm, 1), jnp.float32),   # running max
                    pltpu.VMEM((tm, 1), jnp.float32),   # running sum-exp -> lse
                ],
            ),
            compiler_params=pltpu.CompilerParams(
                dimension_semantics=("parallel", "arbitrary", "arbitrary"),
                vmem_limit_bytes=64 * 1024 * 1024,   # <= per-TC physical on v7x
            ),
        )(x2, w, b2)

    return out[:rows, :V].reshape(B, S, V)


# ----------------------------------------------------------------------------
# References
# ----------------------------------------------------------------------------
def _reference(x, weight, bias, compute_dtype):
    # Mirrors the kernel's dtype choices (bf16 matmul, f32 softmax).
    logits = jnp.einsum(
        "bse,ve->bsv",
        x.astype(compute_dtype), weight.astype(compute_dtype),
        preferred_element_type=jnp.float32,
    ) + bias.astype(jnp.float32)
    return jax.nn.log_softmax(logits, axis=-1)


def _reference_f32(x, weight, bias):
    logits = jnp.einsum("bse,ve->bsv", x, weight) + bias
    return jax.nn.log_softmax(logits, axis=-1)


if __name__ == "__main__":
    # Small shapes consistent with the module: embed_dim=32, tgt_vocab=256
    B, S, E, V = 2, 8, 32, 256

    key = jax.random.PRNGKey(0)
    kx, kw, kb = jax.random.split(key, 3)

    # Deterministic parameter init (mimics nn.Linear uniform(-1/sqrt(E), 1/sqrt(E)))
    bound = 1.0 / (E ** 0.5)
    weight = jax.random.uniform(kw, (V, E), jnp.float32, -bound, bound)
    bias = jax.random.uniform(kb, (V,), jnp.float32, -bound, bound)

    x = jax.random.normal(kx, (B, S, E), jnp.float32)

    ref = _reference(x, weight, bias, jnp.bfloat16)
    ref32 = _reference_f32(x, weight, bias)

    # Fast (single-tile) path.
    out = vocab_output_log_softmax(x, weight, bias)
    out = jax.block_until_ready(out)
    assert out.shape == (B, S, V)
    assert jnp.allclose(out, ref, atol=1e-3, rtol=1e-3), "single-pass mismatch vs bf16 reference"
    assert jnp.allclose(out, ref32, atol=5e-2, rtol=5e-2), "single-pass mismatch vs f32 reference"

    # Streaming (vocab-tiled) path, forced by shrinking tv_max.
    out_s = vocab_output_log_softmax(x, weight, bias, tv_max=128)
    out_s = jax.block_until_ready(out_s)
    assert out_s.shape == (B, S, V)
    assert jnp.allclose(out_s, ref, atol=1e-3, rtol=1e-3), "streaming mismatch vs bf16 reference"
    assert jnp.allclose(out_s, ref32, atol=5e-2, rtol=5e-2), "streaming mismatch vs f32 reference"

    print("KERNEL_OK")
</pallas_src>

<mosaic_0001>
module attributes {stable_mosaic.version = 11 : i64} {
  func.func @_single_pass_kernel(%arg0: i32, %arg1: memref<16x32xbf16, #tpu.memory_space<vmem>>, %arg2: memref<256x32xbf16, #tpu.memory_space<vmem>>, %arg3: memref<1x256xf32, #tpu.memory_space<vmem>>, %arg4: memref<16x256xf32, #tpu.memory_space<vmem>>) attributes {dimension_semantics = [#tpu.dimension_semantics<parallel>], iteration_bounds = array<i64: 1>, scalar_prefetch = 0 : i64, scratch_operands = 0 : i64, tpu.core_type = #tpu.core_type<tc>, window_params = [{transform_indices = @transform_0, window_bounds = array<i64: 16, 32>}, {pipeline_mode = #tpu.pipeline_mode<synchronous>, transform_indices = @transform_1, window_bounds = array<i64: 256, 32>}, {pipeline_mode = #tpu.pipeline_mode<synchronous>, transform_indices = @transform_2, window_bounds = array<i64: 1, 256>}, {transform_indices = @transform_3, window_bounds = array<i64: 16, 256>}]} {
    %c0 = arith.constant 0 : index
    %c0_0 = arith.constant 0 : index
    %0 = vector.load %arg1[%c0, %c0_0] : memref<16x32xbf16, #tpu.memory_space<vmem>>, vector<16x32xbf16>
    %c0_1 = arith.constant 0 : index
    %c0_2 = arith.constant 0 : index
    %1 = vector.load %arg2[%c0_1, %c0_2] : memref<256x32xbf16, #tpu.memory_space<vmem>>, vector<256x32xbf16>
    %cst = arith.constant dense<0.000000e+00> : vector<16x256xf32>
    %2 = tpu.matmul %0, %1, %cst {dimension_numbers = #tpu.dot_dimension_numbers<[1], [1], [0], [0], [0, 0, 1, 0], [], []>} : vector<16x32xbf16>, vector<256x32xbf16>, vector<16x256xf32> -> vector<16x256xf32>
    %c0_3 = arith.constant 0 : index
    %c0_4 = arith.constant 0 : index
    %3 = vector.load %arg3[%c0_3, %c0_4] : memref<1x256xf32, #tpu.memory_space<vmem>>, vector<1x256xf32>
    %4 = vector.broadcast %3 : vector<1x256xf32> to vector<16x256xf32>
    %5 = arith.addf %2, %4 : vector<16x256xf32>
    %cst_5 = arith.constant dense<0xFF800000> : vector<16xf32>
    %6 = vector.multi_reduction <maximumf>, %5, %cst_5 [1] : vector<16x256xf32> to vector<16xf32>
    %7 = vector.shape_cast %6 : vector<16xf32> to vector<16x1xf32>
    %8 = vector.broadcast %7 : vector<16x1xf32> to vector<16x256xf32>
    %9 = arith.subf %5, %8 : vector<16x256xf32>
    %10 = math.exp %9 : vector<16x256xf32>
    %cst_6 = arith.constant dense<0.000000e+00> : vector<16xf32>
    %11 = vector.multi_reduction <add>, %10, %cst_6 [1] : vector<16x256xf32> to vector<16xf32>
    %12 = vector.shape_cast %11 : vector<16xf32> to vector<16x1xf32>
    %13 = math.log %12 : vector<16x1xf32>
    %14 = arith.addf %7, %13 : vector<16x1xf32>
    %15 = vector.broadcast %14 : vector<16x1xf32> to vector<16x256xf32>
    %16 = arith.subf %5, %15 : vector<16x256xf32>
    %c0_7 = arith.constant 0 : index
    %c0_8 = arith.constant 0 : index
    %17 = vector.load %arg4[%c0_7, %c0_8] : memref<16x256xf32, #tpu.memory_space<vmem>>, vector<16x256xf32>
    tpu.vector_store %arg4[%c0_7, %c0_8], %16 {strides = array<i32>} : memref<16x256xf32, #tpu.memory_space<vmem>>, vector<16x256xf32>,
    return
  }
  func.func @transform_0(%arg0: i32) -> (i32, i32) {
    %c0_i32 = arith.constant 0 : i32
    %c0_i32_0 = arith.constant 0 : i32
    return %arg0, %c0_i32 : i32, i32
  }
  func.func @transform_1(%arg0: i32) -> (i32, i32) {
    %c0_i32 = arith.constant 0 : i32
    %c0_i32_0 = arith.constant 0 : i32
    %c0_i32_1 = arith.constant 0 : i32
    return %c0_i32, %c0_i32_0 : i32, i32
  }
  func.func @transform_2(%arg0: i32) -> (i32, i32) {
    %c0_i32 = arith.constant 0 : i32
    %c0_i32_0 = arith.constant 0 : i32
    %c0_i32_1 = arith.constant 0 : i32
    return %c0_i32, %c0_i32_0 : i32, i32
  }
  func.func @transform_3(%arg0: i32) -> (i32, i32) {
    %c0_i32 = arith.constant 0 : i32
    %c0_i32_0 = arith.constant 0 : i32
    return %arg0, %c0_i32 : i32, i32
  }
}

</mosaic_0001>

<bundles_post_ra>
// kernel: tpu_custom_call.1
= control target key start
LH: loop header
LB: loop body
LE: loop exit
PB: predicated region body
PF: predicated region fallthrough
CT: control target
= control target key end

     0   :  { %vm140_vm0 = vcmask 261120   ;;  %s502_s0 = inlined_call_operand.vmem [shape: bf16[16,32], index: 0, kind: input, shape index: {}]   ;;  %s503_s1 = inlined_call_operand.vmem [shape: bf16[256,32], index: 1, kind: input, shape index: {}]   ;;  %s504_s2 = inlined_call_operand.vmem [shape: f32[1,256], index: 2, kind: input, shape index: {}]   ;;  %s505_s3 = inlined_call_operand.hbm [shape: f32[16,256], index: 3, kind: output, shape index: {}]  }
   0x1   :  { %v354_v0 = vld [vmem:[%s503_s1 + $0x38] sm:$0xff]  ;;  %v353_v4 = vld [vmem:[%s503_s1 + $0x30] sm:$0xff] }
   0x2   :  { %v362_v1 = vld [vmem:[%s503_s1 + $0x78] sm:$0xff]  ;;  %v166_v2 = vsel %vm140_vm0, %v354_v0, 0  ;;  %v361_v5 = vld [vmem:[%s503_s1 + $0x70] sm:$0xff] }
   0x3   :  { %v190_v3 = vsel %vm140_vm0, %v362_v1, 0  ;;  %192 = vmatpush.bf16.xpose.msra.mxu0 %v166_v2 }
   0x4   :  { %206 = vmatpush.bf16.xpose.msra.mxu1 %v190_v3 }
   0x5   :  { %8 = vsyncpa [#allocation3], 0  ;;  %v163_v6 = vsel %vm140_vm0, %v353_v4, 0  ;;  %v187_v7 = vsel %vm140_vm0, %v361_v5, 0  ;;  %v352_v8 = vld [vmem:[%s503_s1 + $0x28] sm:$0xff]  ;;  %v351_v12 = vld [vmem:[%s503_s1 + $0x20] sm:$0xff] }
   0x6   :  { %v360_v9 = vld [vmem:[%s503_s1 + $0x68] sm:$0xff]  ;;  %v160_v10 = vsel %vm140_vm0, %v352_v8, 0  ;;  %v359_v13 = vld [vmem:[%s503_s1 + $0x60] sm:$0xff]  ;;  %v157_v14 = vsel %vm140_vm0, %v351_v12, 0  ;;  %v350_v16 = vld [vmem:[%s503_s1 + $0x18] sm:$0xff]  ;;  %s264_s22 = sshll.u32 %s505_s3, 4  ;;  %s265_s22 = int_to_ptr.hbm [resolvable:$true] %s264_s22 }
   0x7   :  { %v184_v11 = vsel %vm140_vm0, %v360_v9, 0  ;;  %v181_v15 = vsel %vm140_vm0, %v359_v13, 0  ;;  %v358_v17 = vld [vmem:[%s503_s1 + $0x58] sm:$0xff]  ;;  %v154_v18 = vsel %vm140_vm0, %v350_v16, 0  ;;  %v349_v20 = vld [vmem:[%s503_s1 + $0x10] sm:$0xff]  ;;  %v348_v24 = vld [vmem:[%s503_s1 + $0x8] sm:$0xff] }
   0x8   :  { %v178_v19 = vsel %vm140_vm0, %v358_v17, 0  ;;  %v357_v21 = vld [vmem:[%s503_s1 + $0x50] sm:$0xff]  ;;  %v151_v22 = vsel %vm140_vm0, %v349_v20, 0  ;;  %v356_v25 = vld [vmem:[%s503_s1 + $0x48] sm:$0xff]  ;;  %v148_v26 = vsel %vm140_vm0, %v348_v24, 0  ;;  %v347_v28 = vld [vmem:[%s503_s1] sm:$0xff] }
   0x9   :  { %v175_v23 = vsel %vm140_vm0, %v357_v21, 0  ;;  %v172_v27 = vsel %vm140_vm0, %v356_v25, 0  ;;  %v355_v29 = vld [vmem:[%s503_s1 + $0x40] sm:$0xff]  ;;  %v145_v30 = vsel %vm140_vm0, %v347_v28, 0  ;;  %s405_s23 = smov 256   ;;  %s406_s24 = smov 16  }
   0xa   :  { %v169_v31 = vsel %vm140_vm0, %v355_v29, 0  ;;  %v346_v32 = vld [vmem:[%s502_s0] sm:$0xff]  ;;  %s404_s0 = smov [#allocation2]  }
   0xb   :  { %193 = vmatpush.bf16.xpose.msra.mxu0 %v163_v6  ;;  %v49_v33 = vld [vmem:[%s504_s2] sm:$0x3]  ;;  %s262_s1 = sshll.u32 %s404_s0, 4  ;;  %s263_s1 = int_to_ptr.vmem [resolvable:$true] %s262_s1 }
   0xc   :  { %207 = vmatpush.bf16.xpose.msra.mxu1 %v187_v7  ;;  %v51_v34 = vperm.slane %v49_v33, 0  ;;  %v52_v35 = vperm.slane %v49_v33, 1 }
  0x13   :  { %194 = vmatpush.bf16.xpose.msra.mxu0 %v160_v10 }
  0x14   :  { %208 = vmatpush.bf16.xpose.msra.mxu1 %v184_v11 }
  0x1b   :  { %195 = vmatpush.bf16.xpose.msra.mxu0 %v157_v14 }
  0x1c   :  { %209 = vmatpush.bf16.xpose.msra.mxu1 %v181_v15 }
  0x23   :  { %196 = vmatpush.bf16.xpose.msra.mxu0 %v154_v18 }
  0x24   :  { %210 = vmatpush.bf16.xpose.msra.mxu1 %v178_v19 }
  0x2b   :  { %197 = vmatpush.bf16.xpose.msra.mxu0 %v151_v22 }
  0x2c   :  { %211 = vmatpush.bf16.xpose.msra.mxu1 %v175_v23 }
  0x33   :  { %198 = vmatpush.bf16.xpose.msra.mxu0 %v148_v26 }
  0x34   :  { %212 = vmatpush.bf16.xpose.msra.mxu1 %v172_v27 }
  0x3b   :  { %199 = vmatpush.bf16.xpose.msra.mxu0 %v145_v30 }
  0x3c   :  { %213 = vmatpush.bf16.xpose.msra.mxu1 %v169_v31 }
  0x42   :  { %344 = vmatmul.msk.bf16.vlgmr.msra.gmra.mxu0 %vm140_vm0, %v346_v32 }
  0x43   :  { %345 = vmatmul.msk.bf16.vlgmr.msra.gmra.mxu1 %vm140_vm0, %v346_v32 }
  0xbf   :  { %v201_v36 = vpop.f32.mrf.mxu0 }
  0xc0   :  { %v215_v37 = vpop.f32.mrf.mxu1  ;;  %v202_v38 = vadd.f32 %v201_v36, %v51_v34 }
  0xc1   :  { %v216_v39 = vadd.f32 %v215_v37, %v52_v35 }
  0xc3   :  { %v220_v40 = vmax.f32 %v202_v38, %v216_v39 }
  0xc5   :  { %221 = vmax.xlane.f32.xlu0 %v220_v40 }
  0xc7   :  { %v203_v41 = vpop.f32.mrf.mxu0 }
  0xc8   :  { %v217_v42 = vpop.f32.mrf.mxu1  ;;  %v204_v43 = vadd.f32 %v203_v41, %v51_v34 }
  0xc9   :  { %v218_v44 = vadd.f32 %v217_v42, %v52_v35 }
  0xcb   :  { %v223_v45 = vmax.f32 %v204_v43, %v218_v44 }
  0xcd   :  { %224 = vmax.xlane.f32.xlu0 %v223_v45 }
 0x138   :  { %v222_v46 = vpop.xlane.xlu0 %221 }
 0x139   :  { %v226_v47 = vsub.f32 %v202_v38, %v222_v46  ;;  %v227_v48 = vsub.f32 %v216_v39, %v222_v46 }
 0x13b   :  { %v230_v49 = vmul.f32 1.442695, %v226_v47  ;;  %v232_v50 = vmul.f32 1.442695, %v227_v48 }
 0x13d   :  { %366 = vpow2.f32 %v230_v49 }
 0x13e   :  { %368 = vpow2.f32 %v232_v50 }
 0x140   :  { %v225_v51 = vpop.xlane.xlu0 %224 }
 0x141   :  { %v228_v52 = vsub.f32 %v204_v43, %v225_v51  ;;  %v229_v53 = vsub.f32 %v218_v44, %v225_v51 }
 0x143   :  { %v367_v54 = vpop.eup %366  ;;  %v234_v55 = vmul.f32 1.442695, %v228_v52  ;;  %v236_v56 = vmul.f32 1.442695, %v229_v53 }
 0x144   :  { %v369_v57 = vpop.eup %368 }
 0x145   :  { %370 = vpow2.f32 %v234_v55  ;;  %v238_v58 = vadd.f32 %v369_v57, %v367_v54 }
 0x146   :  { %372 = vpow2.f32 %v236_v56 }
 0x147   :  { %239 = vadd.xlane.f32.xlu1 %v238_v58 }
 0x14b   :  { %v371_v59 = vpop.eup %370 }
 0x14c   :  { %v373_v60 = vpop.eup %372 }
 0x14d   :  { %v241_v61 = vadd.f32 %v373_v60, %v371_v59 }
 0x14f   :  { %242 = vadd.xlane.f32.xlu1 %v241_v61 }
 0x1ba   :  { %v240_v62 = vpop.xlane.xlu1 %239 }
 0x1bb   :  { %374 = vlog2.f32 %v240_v62 }
 0x1c1   :  { %v375_v63 = vpop.eup %374 }
 0x1c2   :  { %v245_v0 = vmul.f32 0.6931472, %v375_v63  ;;  %v243_v1 = vpop.xlane.xlu1 %242 }
 0x1c3   :  { %376 = vlog2.f32 %v243_v1 }
 0x1c4   :  { %v248_v2 = vadd.f32 %v245_v0, %v222_v46 }
 0x1c6   :  { %v250_v3 = vsub.f32 %v202_v38, %v248_v2  ;;  %v251_v4 = vsub.f32 %v216_v39, %v248_v2 }
 0x1c8   :  { %254 = vst [vmem:[#allocation2] sm:$0xff] %v250_v3 }
 0x1c9   :  { %v377_v5 = vpop.eup %376  ;;  %255 = vst [vmem:[#allocation2 + $0x8] sm:$0xff] %v251_v4 }
 0x1ca   :  { %v247_v6 = vmul.f32 0.6931472, %v377_v5 }
 0x1cc   :  { %v249_v7 = vadd.f32 %v247_v6, %v225_v51 }
 0x1ce   :  { %v252_v8 = vsub.f32 %v204_v43, %v249_v7  ;;  %v253_v9 = vsub.f32 %v218_v44, %v249_v7 }
 0x1d0   :  { %256 = vst [vmem:[#allocation2 + $0x10] sm:$0xff] %v252_v8 }
 0x1d1   :  { %257 = vst [vmem:[#allocation2 + $0x18] sm:$0xff] %v253_v9 }
 0x1d2   :  { %270 = dma.vmem_to_hbm [thread:$0]  %s263_s1, 512, %s265_s22, [#allocation3], %s405_s23, %s405_s23, %s406_s24  }
 0x1d3   :  { %402 = dma.done.wait [#allocation3], 512  }
 0x1d4   :  { %403 = vsyncadd [#allocation3], 4294966784 }
 0x1d5   :  { %275 = vsyncpa [#allocation3], 1 }

</bundles_post_ra>
